<compile_context>
chip_gen: v7x
topology: tpu7x:2x2x1
jax: 0.10.0
libtpu: 0.0.40
codegen_flags: <defaults>
</compile_context>

<pallas_src>
import math
import functools

import jax
import jax.numpy as jnp
from jax import lax
from jax.experimental import pallas as pl
from jax.experimental.pallas import tpu as pltpu

_LOG2E = math.log2(math.e)


# ---------------------------------------------------------------------------
# Helpers: generation-aware VMEM budget and tile picking
# ---------------------------------------------------------------------------
def _vmem_capacity_bytes():
    try:
        return int(pltpu.get_tpu_info().vmem_capacity_bytes)
    except Exception:
        return 128 * 1024 * 1024  # conservative fallback (v5e/v6e size)


def _vmem_limit_bytes(capacity):
    # Leave Mosaic headroom for internal scratch: ~3/4 of physical, cap 100 MiB.
    # v5e/v6e (128 MiB) -> 96 MiB; v7x (64 MiB) -> 48 MiB.
    return min((capacity * 3) // 4, 100 * 1024 * 1024)


def _largest_tile(s, target):
    """Largest multiple of 8 that divides s and is <= target (falls back to s)."""
    best = None
    t = 8
    while t <= min(s, target):
        if s % t == 0:
            best = t
        t += 8
    return best if best is not None else s


def _resident_spec():
    # Whole-array VMEM resident: loaded once, not pipelined / double-buffered.
    return pl.BlockSpec(memory_space=pltpu.MemorySpace.VMEM)


# ---------------------------------------------------------------------------
# Pass 1: fused K/V projection, lane-dense fused-layout outputs.
# ---------------------------------------------------------------------------
def _kv_proj_kernel(x_ref, wk_ref, bk_ref, wv_ref, bv_ref, k_ref, v_ref):
    x = x_ref[0].astype(wk_ref.dtype)                       # (tr, d_model)
    # Two lane-dense matmuls against resident weights; ONE full-width store each.
    k_ref[0] = (jnp.dot(x, wk_ref[...], preferred_element_type=jnp.float32)
                + bk_ref[...]).astype(k_ref.dtype)          # (tr, H*d_key)
    v_ref[0] = (jnp.dot(x, wv_ref[...], preferred_element_type=jnp.float32)
                + bv_ref[...]).astype(v_ref.dtype)          # (tr, H*d_model)


# ---------------------------------------------------------------------------
# Pass 2: flash-style online-softmax attention with fused Q- and out-projection.
# ---------------------------------------------------------------------------
def _flash_attn_kernel(x_ref, wq_ref, bq_ref, k_ref, v_ref, wo_ref, bo_ref,
                       out_ref, q_sc, m_sc, l_sc, acc_sc, *,
                       n_heads, d_key, d_model):
    ki = pl.program_id(2)

    @pl.when(ki == 0)
    def _init():
        # Fused Q projection: scale * log2(e) is pre-folded into wq/bq, so the
        # hot loop can use exp2 with no extra per-score multiply.  Q lives in
        # VMEM scratch across all kv steps (no HBM round trip).
        x = x_ref[0].astype(wq_ref.dtype)                   # (tq, d_model)
        q = jnp.dot(x, wq_ref[...],
                    preferred_element_type=jnp.float32) + bq_ref[...]
        q_sc[...] = q.astype(q_sc.dtype)                    # (tq, H*d_key)
        m_sc[...] = jnp.full(m_sc.shape, -jnp.inf, m_sc.dtype)
        l_sc[...] = jnp.zeros(l_sc.shape, l_sc.dtype)
        acc_sc[...] = jnp.zeros(acc_sc.shape, acc_sc.dtype)

    # Per-head online softmax (static Python unroll; slices are static).
    for h in range(n_heads):
        q_h = q_sc[:, h * d_key:(h + 1) * d_key]                 # (tq, d_key)
        k_h = k_ref[0, :, h * d_key:(h + 1) * d_key]             # (tk, d_key)
        v_h = v_ref[0, :, h * d_model:(h + 1) * d_model]         # (tk, d_model)

        # q @ k^T without an explicit transpose (contract the d_key axes).
        s = lax.dot_general(q_h, k_h, (((1,), (1,)), ((), ())),
                            preferred_element_type=jnp.float32)  # (tq, tk), log2 domain

        m_prev = m_sc[h]                                         # (tq, 1)
        m_new = jnp.maximum(m_prev, jnp.max(s, axis=-1, keepdims=True))
        alpha = jnp.exp2(m_prev - m_new)
        p = jnp.exp2(s - m_new)                                  # (tq, tk) f32
        l_sc[h] = alpha * l_sc[h] + jnp.sum(p, axis=-1, keepdims=True)
        acc_sc[h] = alpha * acc_sc[h] + jnp.dot(
            p.astype(v_h.dtype), v_h, preferred_element_type=jnp.float32)
        m_sc[h] = m_new

    @pl.when(ki == pl.num_programs(2) - 1)
    def _finalize():
        # No head concat: out = bo + sum_h (acc_h / l_h) @ Wo^T[h*dm:(h+1)*dm, :]
        # Exact reciprocal — this runs once per (b, q-block), off the hot loop.
        out = bo_ref[...]                                        # (1, d_model) f32
        for h in range(n_heads):
            o_h = acc_sc[h] / l_sc[h]                            # (tq, d_model) f32
            out = out + jnp.dot(
                o_h.astype(wo_ref.dtype),
                wo_ref[h * d_model:(h + 1) * d_model, :],
                preferred_element_type=jnp.float32)
        out_ref[0] = out.astype(out_ref.dtype)


# ---------------------------------------------------------------------------
# Wrapper
# ---------------------------------------------------------------------------
def multi_head_self_attention(x, params, *, tq=None, tk=None, tr=None,
                              compute_dtype=jnp.bfloat16):
    """x: (B, S, d_model).  params: fused params from prepare_fused_params().

    compute_dtype: dtype of MXU matmul operands and the stored K/V / Q scratch.
    bf16 (default) is native on v5e/v6e/v7x MXUs; softmax statistics and all
    accumulation stay float32 regardless.
    """
    B, S, d_model = x.shape
    n_heads = params["n_heads"]
    d_key = params["d_key"]
    hdk = n_heads * d_key
    hdm = n_heads * d_model

    wq = params["wq"].astype(compute_dtype)      # (d_model, H*d_key), scale*log2e folded
    bq = params["bq"]                            # (1, H*d_key) f32, scale*log2e folded
    wk = params["wk"].astype(compute_dtype)      # (d_model, H*d_key)
    bk = params["bk"]                            # (1, H*d_key) f32
    wv = params["wv"].astype(compute_dtype)      # (d_model, H*d_model)
    bv = params["bv"]                            # (1, H*d_model) f32
    wo_t = params["wo_t"].astype(compute_dtype)  # (H*d_model, d_model)
    bo = params["bo"]                            # (1, d_model) f32
    assert wq.shape == (d_model, hdk)
    assert wo_t.shape == (hdm, d_model)

    # Generation-aware VMEM budget and default tiles.
    vmem_cap = _vmem_capacity_bytes()
    vmem_limit = _vmem_limit_bytes(vmem_cap)
    big_vmem = vmem_cap >= 96 * 1024 * 1024      # v5e/v6e (128 MiB) vs v7x (64 MiB)
    tr = _largest_tile(S, 256) if tr is None else tr
    tq = _largest_tile(S, 256 if big_vmem else 128) if tq is None else tq
    tk = _largest_tile(S, 128) if tk is None else tk
    assert S % tr == 0 and S % tq == 0 and S % tk == 0
    assert tr % 8 == 0 and tq % 8 == 0 and tk % 8 == 0

    # ---- Pass 1: K/V projection -> lane-dense fused layouts ----------------
    k, v = pl.pallas_call(
        _kv_proj_kernel,
        out_shape=(
            jax.ShapeDtypeStruct((B, S, hdk), compute_dtype),
            jax.ShapeDtypeStruct((B, S, hdm), compute_dtype),
        ),
        grid_spec=pltpu.PrefetchScalarGridSpec(
            num_scalar_prefetch=0,
            grid=(B, S // tr),
            in_specs=[
                pl.BlockSpec((1, tr, d_model), lambda b, r: (b, r, 0)),  # x tile
                _resident_spec(),   # wk
                _resident_spec(),   # bk
                _resident_spec(),   # wv
                _resident_spec(),   # bv
            ],
            out_specs=[
                pl.BlockSpec((1, tr, hdk), lambda b, r: (b, r, 0)),
                pl.BlockSpec((1, tr, hdm), lambda b, r: (b, r, 0)),
            ],
        ),
        compiler_params=pltpu.CompilerParams(
            dimension_semantics=("parallel", "parallel"),
            vmem_limit_bytes=vmem_limit),
    )(x, wk, bk, wv, bv)

    # ---- Pass 2: flash attention + fused Q / output projections ------------
    flash_kernel = functools.partial(
        _flash_attn_kernel, n_heads=n_heads, d_key=d_key, d_model=d_model)

    out = pl.pallas_call(
        flash_kernel,
        out_shape=jax.ShapeDtypeStruct((B, S, d_model), x.dtype),
        grid_spec=pltpu.PrefetchScalarGridSpec(
            num_scalar_prefetch=0,
            grid=(B, S // tq, S // tk),
            in_specs=[
                pl.BlockSpec((1, tq, d_model), lambda b, qi, ki: (b, qi, 0)),  # x q-tile
                _resident_spec(),   # wq (scale*log2e folded)
                _resident_spec(),   # bq
                pl.BlockSpec((1, tk, hdk), lambda b, qi, ki: (b, ki, 0)),      # K tile
                pl.BlockSpec((1, tk, hdm), lambda b, qi, ki: (b, ki, 0)),      # V tile
                _resident_spec(),   # wo^T
                _resident_spec(),   # bo
            ],
            out_specs=pl.BlockSpec((1, tq, d_model), lambda b, qi, ki: (b, qi, 0)),
            scratch_shapes=[
                pltpu.VMEM((tq, hdk), compute_dtype),             # Q tile (resident)
                pltpu.VMEM((n_heads, tq, 1), jnp.float32),        # running max (log2 dom.)
                pltpu.VMEM((n_heads, tq, 1), jnp.float32),        # running sum
                pltpu.VMEM((n_heads, tq, d_model), jnp.float32),  # running head outputs
            ],
        ),
        compiler_params=pltpu.CompilerParams(
            dimension_semantics=("parallel", "parallel", "arbitrary"),
            vmem_limit_bytes=vmem_limit),
    )(x, wq, bq, k, v, wo_t, bo)

    return out


# ---------------------------------------------------------------------------
# Parameter construction
# ---------------------------------------------------------------------------
def init_params(key, d_model, d_key, n_heads):
    """Deterministic init mimicking nn.Linear (uniform +/- 1/sqrt(fan_in)).
    PyTorch Linear weight layout: (out_features, in_features)."""
    ks = jax.random.split(key, 8)

    def u(k, shape, fan_in):
        bound = 1.0 / math.sqrt(fan_in)
        return jax.random.uniform(k, shape, jnp.float32, -bound, bound)

    return {
        "wq": u(ks[0], (n_heads, d_key, d_model), d_model),
        "wk": u(ks[1], (n_heads, d_key, d_model), d_model),
        "wv": u(ks[2], (n_heads, d_model, d_model), d_model),
        "bq": u(ks[3], (n_heads, d_key), d_model),
        "bk": u(ks[4], (n_heads, d_key), d_model),
        "bv": u(ks[5], (n_heads, d_model), d_model),
        "wo": u(ks[6], (d_model, n_heads * d_model), n_heads * d_model),
        "bo": u(ks[7], (d_model,), n_heads * d_model),
    }


def prepare_fused_params(p, d_key):
    """Build fused, lane-dense kernel weights.

    1/sqrt(d_key) * log2(e) is folded into Wq/bq so the attention hot loop can
    use exp2 with no per-score rescale.
    """
    wq, wk, wv, wo = p["wq"], p["wk"], p["wv"], p["wo"]
    bq, bk, bv, bo = p["bq"], p["bk"], p["bv"], p["bo"]
    n_heads, _, d_model = wq.shape
    scale = (1.0 / math.sqrt(d_key)) * _LOG2E

    # (in=d_model, out) layouts, head-major along the output (lane) axis.
    wq_all = wq.transpose(2, 0, 1).reshape(d_model, n_heads * d_key) * scale
    wk_all = wk.transpose(2, 0, 1).reshape(d_model, n_heads * d_key)
    wv_all = wv.transpose(2, 0, 1).reshape(d_model, n_heads * d_model)

    return {
        "wq": wq_all, "bq": bq.reshape(1, n_heads * d_key) * scale,
        "wk": wk_all, "bk": bk.reshape(1, n_heads * d_key),
        "wv": wv_all, "bv": bv.reshape(1, n_heads * d_model),
        "wo_t": wo.T, "bo": bo.reshape(1, d_model),
        "n_heads": int(n_heads), "d_key": int(d_key),
    }


# ---------------------------------------------------------------------------
# Pure-JAX reference (head-by-head, exactly the module's math)
# ---------------------------------------------------------------------------
def reference(x, p, d_key):
    n_heads = p["wq"].shape[0]
    heads = []
    for h in range(n_heads):
        q = x @ p["wq"][h].T + p["bq"][h]
        k = x @ p["wk"][h].T + p["bk"][h]
        v = x @ p["wv"][h].T + p["bv"][h]
        s = (q @ jnp.swapaxes(k, -1, -2)) / math.sqrt(d_key)
        a = jax.nn.softmax(s, axis=-1)
        heads.append(a @ v)
    cat = jnp.concatenate(heads, axis=-1)
    return cat @ p["wo"].T + p["bo"]


if __name__ == "__main__":
    d_model, d_key, n_heads = 32, 16, 4
    B, S = 2, 16          # tq=tk=tr=8 exercises the tiled / online-softmax path

    key = jax.random.PRNGKey(0)
    kx, kp = jax.random.split(key)
    x = jax.random.normal(kx, (B, S, d_model), jnp.float32)
    raw_params = init_params(kp, d_model, d_key, n_heads)
    fused_params = prepare_fused_params(raw_params, d_key)
    ref = reference(x, raw_params, d_key)

    # Production path: bf16 MXU operands, f32 statistics/accumulation.
    out_bf16 = multi_head_self_attention(x, fused_params, tq=8, tk=8, tr=8,
                                         compute_dtype=jnp.bfloat16)
    out_bf16 = jax.block_until_ready(out_bf16)
    assert out_bf16.shape == (B, S, d_model)
    assert jnp.allclose(out_bf16, ref, atol=2e-2, rtol=2e-2), \
        "bf16 kernel mismatch vs pure-JAX reference"

    # f32 path for a tighter numerical check of the kernel structure.
    out_f32 = multi_head_self_attention(x, fused_params, tq=8, tk=8, tr=8,
                                        compute_dtype=jnp.float32)
    out_f32 = jax.block_until_ready(out_f32)
    assert jnp.allclose(out_f32, ref, atol=2e-3, rtol=2e-3), \
        "f32 kernel mismatch vs pure-JAX reference"

    print("KERNEL_OK")
</pallas_src>

<mosaic_0001>
module attributes {stable_mosaic.version = 11 : i64} {
  func.func @_kv_proj_kernel(%arg0: i32, %arg1: i32, %arg2: memref<1x8x32xf32, #tpu.memory_space<vmem>>, %arg3: memref<32x64xbf16, #tpu.memory_space<vmem>>, %arg4: memref<1x64xf32, #tpu.memory_space<vmem>>, %arg5: memref<32x128xbf16, #tpu.memory_space<vmem>>, %arg6: memref<1x128xf32, #tpu.memory_space<vmem>>, %arg7: memref<1x8x64xbf16, #tpu.memory_space<vmem>>, %arg8: memref<1x8x128xbf16, #tpu.memory_space<vmem>>) attributes {dimension_semantics = [#tpu.dimension_semantics<parallel>, #tpu.dimension_semantics<parallel>], iteration_bounds = array<i64: 2, 2>, scalar_prefetch = 0 : i64, scratch_operands = 0 : i64, tpu.core_type = #tpu.core_type<tc>, window_params = [{transform_indices = @transform_0, window_bounds = array<i64: 1, 8, 32>}, {pipeline_mode = #tpu.pipeline_mode<synchronous>, transform_indices = @transform_1, window_bounds = array<i64: 32, 64>}, {pipeline_mode = #tpu.pipeline_mode<synchronous>, transform_indices = @transform_2, window_bounds = array<i64: 1, 64>}, {pipeline_mode = #tpu.pipeline_mode<synchronous>, transform_indices = @transform_3, window_bounds = array<i64: 32, 128>}, {pipeline_mode = #tpu.pipeline_mode<synchronous>, transform_indices = @transform_4, window_bounds = array<i64: 1, 128>}, {transform_indices = @transform_5, window_bounds = array<i64: 1, 8, 64>}, {transform_indices = @transform_6, window_bounds = array<i64: 1, 8, 128>}]} {
    %c0 = arith.constant 0 : index
    %c0_0 = arith.constant 0 : index
    %c0_1 = arith.constant 0 : index
    %0 = vector.load %arg2[%c0, %c0_0, %c0_1] : memref<1x8x32xf32, #tpu.memory_space<vmem>>, vector<1x8x32xf32>
    %1 = vector.shape_cast %0 : vector<1x8x32xf32> to vector<8x32xf32>
    %2 = arith.truncf %1 : vector<8x32xf32> to vector<8x32xbf16>
    %c0_2 = arith.constant 0 : index
    %c0_3 = arith.constant 0 : index
    %3 = vector.load %arg3[%c0_2, %c0_3] : memref<32x64xbf16, #tpu.memory_space<vmem>>, vector<32x64xbf16>
    %cst = arith.constant dense<0.000000e+00> : vector<8x64xf32>
    %4 = tpu.matmul %2, %3, %cst {dimension_numbers = #tpu.dot_dimension_numbers<[1], [0], [0], [1], [0, 0, 1, 1], [], []>} : vector<8x32xbf16>, vector<32x64xbf16>, vector<8x64xf32> -> vector<8x64xf32>
    %c0_4 = arith.constant 0 : index
    %c0_5 = arith.constant 0 : index
    %5 = vector.load %arg4[%c0_4, %c0_5] : memref<1x64xf32, #tpu.memory_space<vmem>>, vector<1x64xf32>
    %6 = vector.broadcast %5 : vector<1x64xf32> to vector<8x64xf32>
    %7 = arith.addf %4, %6 : vector<8x64xf32>
    %8 = arith.truncf %7 : vector<8x64xf32> to vector<8x64xbf16>
    %c0_6 = arith.constant 0 : index
    %c0_7 = arith.constant 0 : index
    %c0_8 = arith.constant 0 : index
    %9 = vector.load %arg7[%c0_6, %c0_7, %c0_8] : memref<1x8x64xbf16, #tpu.memory_space<vmem>>, vector<1x8x64xbf16>
    %10 = vector.shape_cast %9 : vector<1x8x64xbf16> to vector<8x64xbf16>
    %11 = vector.shape_cast %8 : vector<8x64xbf16> to vector<1x8x64xbf16>
    tpu.vector_store %arg7[%c0_6, %c0_7, %c0_8], %11 {strides = array<i32>} : memref<1x8x64xbf16, #tpu.memory_space<vmem>>, vector<1x8x64xbf16>,
    %c0_9 = arith.constant 0 : index
    %c0_10 = arith.constant 0 : index
    %12 = vector.load %arg5[%c0_9, %c0_10] : memref<32x128xbf16, #tpu.memory_space<vmem>>, vector<32x128xbf16>
    %cst_11 = arith.constant dense<0.000000e+00> : vector<8x128xf32>
    %13 = tpu.matmul %2, %12, %cst_11 {dimension_numbers = #tpu.dot_dimension_numbers<[1], [0], [0], [1], [0, 0, 1, 1], [], []>} : vector<8x32xbf16>, vector<32x128xbf16>, vector<8x128xf32> -> vector<8x128xf32>
    %c0_12 = arith.constant 0 : index
    %c0_13 = arith.constant 0 : index
    %14 = vector.load %arg6[%c0_12, %c0_13] : memref<1x128xf32, #tpu.memory_space<vmem>>, vector<1x128xf32>
    %15 = vector.broadcast %14 : vector<1x128xf32> to vector<8x128xf32>
    %16 = arith.addf %13, %15 : vector<8x128xf32>
    %17 = arith.truncf %16 : vector<8x128xf32> to vector<8x128xbf16>
    %c0_14 = arith.constant 0 : index
    %c0_15 = arith.constant 0 : index
    %c0_16 = arith.constant 0 : index
    %18 = vector.load %arg8[%c0_14, %c0_15, %c0_16] : memref<1x8x128xbf16, #tpu.memory_space<vmem>>, vector<1x8x128xbf16>
    %19 = vector.shape_cast %18 : vector<1x8x128xbf16> to vector<8x128xbf16>
    %20 = vector.shape_cast %17 : vector<8x128xbf16> to vector<1x8x128xbf16>
    tpu.vector_store %arg8[%c0_14, %c0_15, %c0_16], %20 {strides = array<i32>} : memref<1x8x128xbf16, #tpu.memory_space<vmem>>, vector<1x8x128xbf16>,
    return
  }
  func.func @transform_0(%arg0: i32, %arg1: i32) -> (i32, i32, i32) {
    %c0_i32 = arith.constant 0 : i32
    %c0_i32_0 = arith.constant 0 : i32
    return %arg0, %arg1, %c0_i32 : i32, i32, i32
  }
  func.func @transform_1(%arg0: i32, %arg1: i32) -> (i32, i32) {
    %c0_i32 = arith.constant 0 : i32
    %c0_i32_0 = arith.constant 0 : i32
    %c0_i32_1 = arith.constant 0 : i32
    return %c0_i32, %c0_i32_0 : i32, i32
  }
  func.func @transform_2(%arg0: i32, %arg1: i32) -> (i32, i32) {
    %c0_i32 = arith.constant 0 : i32
    %c0_i32_0 = arith.constant 0 : i32
    %c0_i32_1 = arith.constant 0 : i32
    return %c0_i32, %c0_i32_0 : i32, i32
  }
  func.func @transform_3(%arg0: i32, %arg1: i32) -> (i32, i32) {
    %c0_i32 = arith.constant 0 : i32
    %c0_i32_0 = arith.constant 0 : i32
    %c0_i32_1 = arith.constant 0 : i32
    return %c0_i32, %c0_i32_0 : i32, i32
  }
  func.func @transform_4(%arg0: i32, %arg1: i32) -> (i32, i32) {
    %c0_i32 = arith.constant 0 : i32
    %c0_i32_0 = arith.constant 0 : i32
    %c0_i32_1 = arith.constant 0 : i32
    return %c0_i32, %c0_i32_0 : i32, i32
  }
  func.func @transform_5(%arg0: i32, %arg1: i32) -> (i32, i32, i32) {
    %c0_i32 = arith.constant 0 : i32
    %c0_i32_0 = arith.constant 0 : i32
    return %arg0, %arg1, %c0_i32 : i32, i32, i32
  }
  func.func @transform_6(%arg0: i32, %arg1: i32) -> (i32, i32, i32) {
    %c0_i32 = arith.constant 0 : i32
    %c0_i32_0 = arith.constant 0 : i32
    return %arg0, %arg1, %c0_i32 : i32, i32, i32
  }
}

</mosaic_0001>

<bundles_post_ra>
// kernel: tpu_custom_call.1
= control target key start
LH: loop header
LB: loop body
LE: loop exit
PB: predicated region body
PF: predicated region fallthrough
CT: control target
= control target key end

     0   :  { %s1547_s0 = inlined_call_operand.hbm [shape: f32[2,16,32], index: 0, kind: input, shape index: {}]   ;;  %s1548_s1 = inlined_call_operand.hbm [shape: bf16[32,64], index: 1, kind: input, shape index: {}]   ;;  %s1549_s2 = inlined_call_operand.hbm [shape: f32[1,64], index: 2, kind: input, shape index: {}]   ;;  %s1550_s3 = inlined_call_operand.hbm [shape: bf16[32,128], index: 3, kind: input, shape index: {}]   ;;  %s1551_s4 = inlined_call_operand.hbm [shape: f32[1,128], index: 4, kind: input, shape index: {}]   ;;  %s1552_s5 = inlined_call_operand.hbm [shape: bf16[2,16,64], index: 5, kind: output, shape index: {0}]   ;;  %s1553_s6 = inlined_call_operand.hbm [shape: bf16[2,16,128], index: 6, kind: output, shape index: {1}]  }
   0x1   :  { %1561 = sst [smem:[#allocation19_spill]] %s1548_s1 }
   0x2   :  { %1562 = sst [smem:[#allocation20_spill]] %s1549_s2 }
   0x3   :  { %1563 = sst [smem:[#allocation21_spill]] %s1550_s3 }
   0x4   :  { %1564 = sst [smem:[#allocation22_spill]] %s1552_s5 }
   0x5   :  { %1565 = sst [smem:[#allocation23_spill]] %s1553_s6 }
   0x6   :  { %12 = vsyncpa [#allocation3], 0 }
   0x7   :  { %14 = vsyncpa [#allocation3 + $0x1], 0 }
   0x8   :  { %15 = vsyncpa [#allocation6], 0 }
   0x9   :  { %16 = vsyncpa [#allocation9], 0 }
   0xa   :  { %17 = vsyncpa [#allocation4], 0 }
   0xb   :  { %19 = vsyncpa [#allocation4 + $0x1], 0 }
   0xc   :  { %20 = vsyncpa [#allocation13], 0 }
   0xd   :  { %22 = vsyncpa [#allocation13 + $0x1], 0  ;;  %s1200_s21 = smov 0   ;;  %s1202_s22 = smov 0  }
   0xe   :  { %s1204_s23 = smov 0   ;;  %s1206_s24 = smov 0  }
   0xf   :  { %s1208_s25 = smov 0   ;;  %s1210_s26 = smov 0  }
  0x10   :  { %s1212_s27 = smov 0   ;;  %s1214_s28 = smov 0  }
  0x11 LB: > { %s1554_s29 = sadd.s32 4294967295, %s1152_s28   ;;  %p685_p0 = scmp.ge.s32.totalorder %s1152_s28, 1  ;;  %s1152_s28 = sphi %s1214_s28, %s28_s28   ;;  %s1148_s27 = sphi %s1212_s27, %s1593_s27   ;;  %s1144_s26 = sphi %s1210_s26, %s1592_s26   ;;  %s1140_s25 = sphi %s1208_s25, %s1591_s25   ;;  %s1136_s24 = sphi %s1206_s24, %s1590_s24   ;;  %s1132_s23 = sphi %s1204_s23, %s1589_s23   ;;  %s1128_s22 = sphi %s1202_s22, %s1588_s22   ;;  %s1124_s21 = sphi %s1200_s21, %s1587_s21  }
  0x12   : > { %p1244_p1 = scmp.eq.s32.totalorder %s1554_s29, 0  ;;  %p213_p2 = scmp.lt.s32.totalorder %s1152_s28, 5 }
  0x13   : > { %s1154_s8 = smov [#allocation5]   ;;  %s1155_s11 = smov [#allocation8]  }
  0x14   : > { %s1566_s30 = scalar_select %p1244_p1, 1, 0 }
  0x15   : > { %p1249_p3 = pnand %p685_p0, %p213_p2  ;;  %s225_s9 = sshll.u32 %s1154_s8, 4  ;;  %s1253_s9 = int_to_ptr.vmem [resolvable:$true] %s225_s9 }
  0x16   : > { %s249_s12 = sshll.u32 %s1155_s11, 4  ;;  %s1156_s13 = smov [#allocation7]   ;;  %s1263_s12 = int_to_ptr.vmem [resolvable:$true] %s249_s12 }
  0x17   : > { %s1567_s7 = scalar_select %p1249_p3, 1, 0 }
  0x18   : > { %p762_p4 = pneg %p1249_p3  ;;  %s1265_s14 = sshll.u32 %s1156_s13, 4  ;;  %s240_s14 = int_to_ptr.vmem [resolvable:$true] %s1265_s14 }
  0x19   : > { %s1569_s1 = sld [smem:[#allocation19_spill]] }
  0x1a   : > { %p1259_p5 = pnand %p762_p4, %p1244_p1 }
  0x1c   : > { %p1275_p7 = pneg %p1259_p5 }
  0x1f   : > { %s872_s17 = scalar_lea.hbm %s1569_s1, 256 }
  0x20   : > { %p873_p6 = scmp.ne.s32.totalorder %s1569_s1, %s872_s17  ;;  %p879_p10 = scmp.lt.u32.totalorder %s872_s17, %s1569_s1 }
  0x22   : > { %p875_p8 = pnand %p1275_p7, %p873_p6 }
  0x24   : > { %p876_p9 = pneg %p875_p8 }
  0x26   : > { %p881_p11 = pnand %p879_p10, %p876_p9 }
  0x28   : > { %884 = shalt.err (!%p881_p11)
}
  0x29   : > { %s885_s13 = scalar_lea.vmem %s1253_s9, 256  ;;  %p893_p2 = scmp.lt.s32.totalorder %s1253_s9, %s1253_s9 }
  0x2a   : > { %p886_p12 = scmp.ne.s32.totalorder %s1253_s9, %s885_s13  ;;  %p894_p4 = scmp.lt.s32.totalorder %s885_s13, %s885_s13 }
  0x2c   : > { %p888_p13 = pnand %p886_p12, %p1275_p7  ;;  %p895_p6 = por %p894_p4, %p893_p2 }
  0x2e   : > { %p889_p0 = pneg %p888_p13 }
  0x30   : > { %p896_p8 = pnand %p895_p6, %p889_p0 }
  0x32   : > { %899 = shalt.err (!%p896_p8)
}
  0x33   : > { %s1157_s15 = smov 64   ;;  %s1158_s16 = smov 4  }
  0x34   : > { %765 = dma.hbm_to_vmem [thread:$0]  (!%p1259_p5), %s1569_s1, 256, %s1253_s9, [#allocation6], %s1157_s15, %s1157_s15, %s1158_s16  }
  0x35   : > { %s1571_s3 = sld [smem:[#allocation21_spill]] }
  0x3b   : > { %s900_s11 = scalar_lea.hbm %s1571_s3, 256 }
  0x3c   : > { %p901_p9 = scmp.ne.s32.totalorder %s1571_s3, %s900_s11  ;;  %p907_p12 = scmp.lt.u32.totalorder %s900_s11, %s1571_s3 }
  0x3e   : > { %p903_p10 = pnand %p901_p9, %p1275_p7 }
  0x40   : > { %p904_p11 = pneg %p903_p10 }
  0x42   : > { %p909_p13 = pnand %p907_p12, %p904_p11 }
  0x44   : > { %912 = shalt.err (!%p909_p13)
}
  0x45   : > { %s913_s9 = scalar_lea.vmem %s1263_s12, 256  ;;  %p921_p6 = scmp.lt.s32.totalorder %s1263_s12, %s1263_s12 }
  0x46   : > { %p914_p0 = scmp.ne.s32.totalorder %s1263_s12, %s913_s9  ;;  %p922_p8 = scmp.lt.s32.totalorder %s913_s9, %s913_s9 }
  0x48   : > { %p916_p2 = pnand %p914_p0, %p1275_p7  ;;  %p923_p9 = por %p922_p8, %p921_p6 }
  0x4a   : > { %p917_p4 = pneg %p916_p2 }
  0x4c   : > { %p924_p10 = pnand %p923_p9, %p917_p4 }
  0x4e   : > { %927 = shalt.err (!%p924_p10)
}
  0x4f   : > { %771 = dma.hbm_to_vmem [thread:$0]  (!%p1259_p5), %s1571_s3, 256, %s1263_s12, [#allocation9], %s1157_s15, %s1157_s15, %s1158_s16  }
  0x50   : > { %s1572_s2 = sld [smem:[#allocation20_spill]] }
  0x56   : > { %s928_s18 = scalar_lea.hbm %s1572_s2, 16 }
  0x57   : > { %p929_p11 = scmp.ne.s32.totalorder %s1572_s2, %s928_s18  ;;  %p935_p0 = scmp.lt.u32.totalorder %s928_s18, %s1572_s2 }
  0x59   : > { %p931_p12 = pnand %p929_p11, %p1275_p7 }
  0x5b   : > { %p932_p13 = pneg %p931_p12 }
  0x5d   : > { %p937_p2 = pnand %p935_p0, %p932_p13 }
  0x5f   : > { %940 = shalt.err (!%p937_p2)
}
  0x60   : > { %s941_s9 = scalar_lea.vmem %s240_s14, 16  ;;  %s948_s12 = scalar_lea.vmem %s240_s14, 32 }
  0x61   : > { %p942_p4 = scmp.ne.s32.totalorder %s240_s14, %s941_s9  ;;  %p949_p9 = scmp.lt.s32.totalorder %s240_s14, %s240_s14 }
  0x62   : > { %p950_p10 = scmp.lt.s32.totalorder %s948_s12, %s941_s9 }
  0x63   : > { %p944_p6 = pnand %p942_p4, %p1275_p7 }
  0x64   : > { %p951_p3 = por %p950_p10, %p949_p9 }
  0x65   : > { %p945_p8 = pneg %p944_p6 }
  0x67   : > { %p952_p1 = pnand %p951_p3, %p945_p8 }
  0x69   : > { %955 = shalt.err (!%p952_p1)
}
  0x6a   : > { %768 = dma.hbm_to_vmem [thread:$0]  (!%p1259_p5), %s1572_s2, 16, %s240_s14, [#allocation6]  }
  0x6b   : > { %s1159_s5 = smov [#allocation10]   ;;  %s956_s18 = scalar_lea.hbm %s1551_s4, 16 }
  0x6c   : > { %s263_s6 = sshll.u32 %s1159_s5, 4  ;;  %p957_p11 = scmp.ne.s32.totalorder %s1551_s4, %s956_s18  ;;  %s264_s6 = int_to_ptr.vmem [resolvable:$true] %s263_s6 }
  0x6d   : > { %p963_p12 = scmp.lt.u32.totalorder %s956_s18, %s1551_s4 }
  0x6e   : > { %p959_p1 = pnand %p957_p11, %p1275_p7 }
  0x70   : > { %p960_p3 = pneg %p959_p1 }
  0x72   : > { %p965_p13 = pnand %p963_p12, %p960_p3 }
  0x74   : > { %968 = shalt.err (!%p965_p13)
}
  0x75   : > { %s969_s14 = scalar_lea.vmem %s264_s6, 16  ;;  %s976_s9 = scalar_lea.vmem %s264_s6, 32 }
  0x76   : > { %p970_p0 = scmp.ne.s32.totalorder %s264_s6, %s969_s14  ;;  %p977_p6 = scmp.lt.s32.totalorder %s264_s6, %s264_s6 }
  0x77   : > { %p978_p8 = scmp.lt.s32.totalorder %s976_s9, %s969_s14 }
  0x78   : > { %p972_p2 = pnand %p970_p0, %p1275_p7 }
  0x79   : > { %p979_p9 = por %p978_p8, %p977_p6 }
  0x7a   : > { %p973_p4 = pneg %p972_p2 }
  0x7c   : > { %p980_p10 = pnand %p979_p9, %p973_p4 }
  0x7e   : > { %983 = shalt.err (!%p980_p10)
}
  0x7f   : > { %774 = dma.hbm_to_vmem [thread:$0]  (!%p1259_p5), %s1551_s4, 16, %s264_s6, [#allocation9]  }
  0x80   : > { %s37_s20 = sadd.s32 1, %s1144_s26  ;;  %s40_s10 = sadd.s32 1, %s1148_s27 }
  0x81   : > { %p38_p7 = scmp.ge.s32.totalorder %s37_s20, 2  ;;  %s684_s16 = sadd.s32 4294967294, %s1152_s28  }
  0x82   : > { %s49_s5 = sadd.s32 1, %s1132_s23  ;;  %p56_p11 = scmp.ne.s32.totalorder %s1132_s23, %s1128_s22 }
  0x83   : > { %s1595_s20 = smov (%p38_p7, %s37_s20), 0  ;;  %s1597_s10 = smov (!%p38_p7, %s40_s10), %s1148_s27 }
  0x84   : > { %s45_s29 = ssub.s32 %s1144_s26, %s1595_s20  ;;  %p42_p1 = scmp.ge.s32.totalorder %s1597_s10, 2 }
  0x85   : > { %p62_p3 = scmp.ne.s32.totalorder %s1128_s22, %s1124_s21  ;;  %p57_p12 = scmp.eq.s32.totalorder %s1152_s28, 0 }
  0x86   : > { %s1573_s6 = sadd.s32 4294967295, %s1152_s28   ;;  %s1599_s10 = smov (%p42_p1, %s1597_s10), 0 }
  0x87   : > { %p172_p5 = scmp.eq.s32.totalorder %s1573_s6, 3  ;;  %p1574_p13 = scmp.ne.s32.totalorder %s1566_s30, 0 }
  0x88   : > { %s44_s19 = ssub.s32 %s1148_s27, %s1599_s10  ;;  %p178_p4 = scmp.eq.s32.totalorder %s684_s16, 3 }
  0x89   : > { %p1376_p0 = por %p1574_p13, %p62_p3  ;;  %p1380_p2 = por %p172_p5, %p56_p11 }
  0x8a   : > { %s46_s8 = sor.u32 %s45_s29, %s44_s19  ;;  %p1386_p6 = por %p57_p12, %p56_p11 }
  0x8b   : > { %s1576_s18 = scalar_select %p1380_p2, 1, 0 }
  0x8c   : > { %p47_p8 = scmp.eq.s32.totalorder %s46_s8, 0  ;;  %p1390_p9 = por %p178_p4, %p62_p3 }
  0x8d   : > { %s274_s14 = sand.u32 1, %s1132_s23   ;;  %s692_s9 = sshll.u32 %s1148_s27, 1 }
  0x8e   : > { %s1578_s13 = scalar_select %p1390_p9, 1, 0 }
  0x8f   : > { %s1397_s12 = scalar_select %p47_p8, %s1132_s23, %s49_s5  }
  0x90   : > { %p790_p10 = scmp.lt.s32.totalorder %s1152_s28, 4  ;;  %s691_s15 = sshll.u32 %s274_s14, 3 }
  0x91   : > { %s283_s6 = sadd.s32 %s1144_s26, %s692_s9  ;;  %s278_s16 = scalar_lea.vmem [#allocation2], %s691_s15 }
  0x92   : > { %s693_s1 = sshll.u32 %s283_s6, 7  ;;  %s287_s29 = sshll.u32 %s278_s16, 4  ;;  %s1406_s29 = int_to_ptr.vmem [resolvable:$true] %s287_s29 }
  0x93   : > { %s1404_s3 = scalar_lea.hbm %s1547_s0, %s693_s1  ;;  %p1410_p7 = pnand %p790_p10, %p1386_p6 }
  0x94   : > { %s275_s8 = scalar_lea.sflag [#allocation3], %s274_s14  ;;  %s984_s9 = scalar_lea.hbm %s1404_s3, 128 }
  0x95   : > { %p985_p11 = scmp.ne.s32.totalorder %s1404_s3, %s984_s9  ;;  %p986_p1 = pneg %p1410_p7 }
  0x96   : > { %s989_s15 = scalar_lea.hbm %s1547_s0, 512  ;;  %p990_p5 = scmp.lt.u32.totalorder %s1404_s3, %s1547_s0 }
  0x97   : > { %p987_p3 = pnand %p986_p1, %p985_p11  ;;  %p991_p13 = scmp.lt.u32.totalorder %s989_s15, %s984_s9 }
  0x98   : > { %p993_p6 = scmp.lt.u32.totalorder %s984_s9, %s1404_s3 }
  0x99   : > { %p988_p12 = pneg %p987_p3  ;;  %p992_p4 = por %p991_p13, %p990_p5 }
  0x9b   : > { %p994_p8 = por %p993_p6, %p992_p4 }
  0x9d   : > { %p995_p10 = pnand %p994_p8, %p988_p12 }
  0x9f   : > { %998 = shalt.err (!%p995_p10)
}
  0xa0   : > { %s999_s14 = scalar_lea.vmem %s1406_s29, 128  ;;  %s1160_s16 = smov [#allocation2]  }
  0xa1   : > { %p1000_p11 = scmp.ne.s32.totalorder %s1406_s29, %s999_s14  ;;  %s1004_s19 = sshll.u32 %s1160_s16, 4  ;;  %s1005_s19 = int_to_ptr.vmem [resolvable:$false] %s1004_s19 }
  0xa2   : > { %s1006_s1 = scalar_lea.vmem %s1005_s19, 256  ;;  %p1007_p2 = scmp.lt.s32.totalorder %s1406_s29, %s1005_s19 }
  0xa3   : > { %p1002_p3 = pnand %p1000_p11, %p986_p1  ;;  %p1008_p5 = scmp.lt.s32.totalorder %s1006_s1, %s999_s14 }
  0xa5   : > { %p1003_p9 = pneg %p1002_p3  ;;  %p1009_p13 = por %p1008_p5, %p1007_p2 }
  0xa7   : > { %p1010_p4 = pnand %p1009_p13, %p1003_p9 }
  0xa9   : > { %1013 = shalt.err (!%p1010_p4)
}
  0xaa   : > { %778 = dma.hbm_to_vmem [thread:$0]  (!%p1410_p7), %s1404_s3, 128, %s1406_s29, %s275_s8  }
  0xab   : > { %p1580_p12 = scmp.ne.s32.totalorder %s1567_s7, 0 }
  0xac   : > { %s1442_s9 = sand.u32 (!%p1580_p12), 1, %s1128_s22  }
  0xad   : > { %296 = sbr.rel (%p1580_p12) target bundleno = 449 (0x1c1), region = 40  ;;  %s695_s2 = sshll.u32 (!%p1580_p12), %s1442_s9, 3 }
  0xae   : > { %s299_s15 = scalar_lea.sflag (!%p1580_p12), [#allocation3], %s1442_s9  ;;  %s302_s11 = scalar_lea.vmem (!%p1580_p12), [#allocation2], %s695_s2 }
  0xb4   : > { %1103 = dma.done.wait (%p1376_p0), %s299_s15, 128  }
  0xb5   : > { %1105 = vsyncadd (%p1376_p0), %s299_s15, 4294967168  ;;  %p1581_p2 = scmp.ne.s32.totalorder %s1566_s30, 0 }
  0xb7   : > { %1107 = dma.done.wait (%p1581_p2), [#allocation6], 272  }
  0xb8   : > { %1109 = vsyncadd (%p1581_p2), [#allocation6], 4294967024 }
  0xb9   : > { %1111 = dma.done.wait (%p1581_p2), [#allocation9], 272  }
  0xba   : > { %1113 = vsyncadd (%p1581_p2), [#allocation9], 4294967024  ;;  %v1161_v0 = vmov 0.0   ;;  %vm1162_vm0 = vmmov 0   ;;  %v868_v1 = vld [vmem:[#allocation5] sm:$0xff]   ;;  %v869_v2 = vld [vmem:[#allocation8] sm:$0xff]  }
  0xbb   : > { %724 = vmatprep.subr.bf16.mxu0 %v1161_v0  ;;  %732 = vmatprep.subr.bf16.mxu1 %v1161_v0  ;;  %v870_v3 = vld [vmem:[#allocation5 + $0x8] sm:$0xff]   ;;  %v871_v4 = vld [vmem:[#allocation8 + $0x8] sm:$0xff]   ;;  %vm378_vm1 = vcmask 261120   ;;  %s712_s3 = sshll.u32 %s1140_s25, 1  ;;  %s700_s30 = sshll.u32 %s1442_s9, 2  ;;  %vm423_vm2 = vcmask 519168  }
  0xbc   : > { %728 = vmatprep.mubr.msk.bf16.mxu0 %vm1162_vm0, %v1161_v0  ;;  %736 = vmatprep.mubr.msk.bf16.mxu1 %vm1162_vm0, %v1161_v0  ;;  %v353_v5 = vld [vmem:[%s302_s11] sm:$0xff]  ;;  %s507_s7 = sadd.s32 %s1136_s24, %s712_s3  ;;  %v706_v8 = vld [vmem:[#allocation10] ss:$0 sm:$0xff]  ;;  %s344_s29 = scalar_lea.vmem [#allocation11], %s700_s30 }
  0xbd   : > { %725 = vmatpush3.bf16.msra.mxu0 %v868_v1  ;;  %733 = vmatpush3.bf16.msra.mxu1 %v869_v2  ;;  %v354_v6 = vpack.c.bf16 %v353_v5, %v353_v5  ;;  %v702_v7 = vld [vmem:[#allocation7] ss:$0 sm:$0xff]  ;;  %s713_s17 = sshll.u32 %s507_s7, 6  ;;  %s511_s5 = sshll.u32 %s344_s29, 4  ;;  %s1466_s5 = int_to_ptr.vmem [resolvable:$true] %s511_s5 }
  0xbe   : > { %726 = vmatprep.subr.bf16.mxu0 %v1161_v0  ;;  %734 = vmatprep.subr.bf16.mxu1 %v1161_v0  ;;  %s351_s8 = scalar_lea.vmem [#allocation12], %s700_s30  ;;  %s1582_s24 = sld [smem:[#allocation22_spill]] }
  0xbf   : > { %s526_s6 = sshll.u32 %s351_s8, 4  ;;  %s1584_s15 = sld [smem:[#allocation23_spill]]  ;;  %s1473_s6 = int_to_ptr.vmem [resolvable:$true] %s526_s6 }
  0xc0   : > { %s491_s3 = scalar_lea.sflag [#allocation4], %s1442_s9  ;;  %s1014_s30 = scalar_lea.vmem %s1466_s5, 64 }
  0xc1   : > { %727 = vmatpush3.bf16.msra.mxu0 %v870_v3  ;;  %735 = vmatpush3.bf16.msra.mxu1 %v871_v4  ;;  %p1015_p0 = scmp.ne.s32.totalorder %s1466_s5, %s1014_s30  ;;  %p1585_p9 = scmp.ne.s32.totalorder %s1576_s18, 0 }
  0xc2   : > { %s1163_s7 = smov [#allocation11]  }
  0xc3   : > { %p1016_p7 = pnand %p1015_p0, %p1585_p9  ;;  %s1018_s25 = sshll.u32 %s1163_s7, 4  ;;  %s1019_s25 = int_to_ptr.vmem [resolvable:$false] %s1018_s25 }
  0xc4   : > { %729 = vmatmul.mubr.msk.bf16.vlgmr.msra.gmra.mrb[0].mxu0 %vm378_vm1, %v354_v6  ;;  %737 = vmatmul.mubr.msk.bf16.vlgmr.msra.gmra.mrb[0].mxu1 %vm378_vm1, %v354_v6  ;;  %s1583_s16 = smov %s1582_s24  ;;  %s1464_s19 = scalar_lea.hbm %s1582_s24, %s713_s17 }
  0xc5   : > { %s1471_s11 = scalar_lea.hbm %s1584_s15, %s713_s17  ;;  %p1017_p1 = pneg %p1016_p7 }
  0xc6   : > { %s1020_s14 = scalar_lea.vmem %s1019_s25, 128  ;;  %p1021_p6 = scmp.lt.s32.totalorder %s1466_s5, %s1019_s25 }
  0xc7   : > { %p1022_p8 = scmp.lt.s32.totalorder %s1020_s14, %s1014_s30 }
  0xc9   : > { %p1023_p10 = por %p1022_p8, %p1021_p6 }
  0xcb   : > { %p1024_p11 = pnand %p1023_p10, %p1017_p1 }
 0x197   : > { %v416_v9 = vpop.f32.mrb[0].mxu0  ;;  %v482_v11 = vpop.f32.mrb[0].mxu1 }
 0x198   : > { %v417_v10 = vadd.f32 %v702_v7, %v416_v9  ;;  %v730_v12 = vpop.f32.mrb[1].mxu0  ;;  %v483_v13 = vadd.f32 %v706_v8, %v482_v11  ;;  %v738_v14 = vpop.f32.mrb[1].mxu1 }
 0x199   : > { %v419_v15 = vpop.f32.mrb[2].mxu0  ;;  %v485_v17 = vpop.f32.mrb[2].mxu1 }
 0x19a   : > { %v422_v16 = vpack.c.bf16 %v417_v10, %v417_v10  ;;  %v731_v18 = vpop.f32.mrb[3].mxu0  ;;  %v488_v19 = vpack.c.bf16 %v483_v13, %v483_v13  ;;  %v739_v20 = vpop.f32.mrb[3].mxu1 }
 0x19c   : > { %424 = vst.msk [vmem:[%s344_s29] sm:$0xf] %vm423_vm2, %v422_v16  ;;  %489 = vst [vmem:[%s351_s8] sm:$0xf] %v488_v19 }
 0x19d   : > { %1027 = shalt.err (!%p1024_p11)
}
 0x19e   : > { %s1028_s17 = scalar_lea.hbm %s1464_s19, 64  ;;  %s1032_s24 = scalar_lea.hbm %s1583_s16, 256 }
 0x19f   : > { %p1029_p3 = scmp.ne.s32.totalorder %s1464_s19, %s1028_s17  ;;  %p1033_p4 = scmp.lt.u32.totalorder %s1464_s19, %s1583_s16 }
 0x1a0   : > { %p1034_p12 = scmp.lt.u32.totalorder %s1032_s24, %s1028_s17  ;;  %p1036_p0 = scmp.lt.u32.totalorder %s1028_s17, %s1464_s19 }
 0x1a1   : > { %p1030_p5 = pnand %p1029_p3, %p1585_p9 }
 0x1a2   : > { %p1035_p2 = por %p1034_p12, %p1033_p4 }
 0x1a3   : > { %p1031_p13 = pneg %p1030_p5 }
 0x1a4   : > { %p1037_p7 = por %p1036_p0, %p1035_p2 }
 0x1a6   : > { %p1038_p1 = pnand %p1037_p7, %p1031_p13 }
 0x1a8   : > { %1041 = shalt.err (!%p1038_p1)
}
 0x1a9   : > { %758 = dma.vmem_to_hbm [thread:$0]  (%p1585_p9), %s1466_s5, 64, %s1464_s19, %s491_s3  }
 0x1aa   : > { %s496_s30 = scalar_lea.sflag [#allocation13], %s1442_s9  ;;  %s1042_s7 = scalar_lea.vmem %s1473_s6, 64 }
 0x1ab   : > { %p1043_p6 = scmp.ne.s32.totalorder %s1473_s6, %s1042_s7  ;;  %s1164_s25 = smov [#allocation12]  }
 0x1ac   : > { %s1046_s14 = sshll.u32 %s1164_s25, 4  ;;  %s1047_s14 = int_to_ptr.vmem [resolvable:$false] %s1046_s14 }
 0x1ad   : > { %p1044_p8 = pnand %p1043_p6, %p1585_p9  ;;  %s1048_s17 = scalar_lea.vmem %s1047_s14, 128 }
 0x1ae   : > { %p1049_p11 = scmp.lt.s32.totalorder %s1473_s6, %s1047_s14  ;;  %p1050_p3 = scmp.lt.s32.totalorder %s1048_s17, %s1042_s7 }
 0x1af   : > { %p1045_p10 = pneg %p1044_p8 }
 0x1b0   : > { %p1051_p5 = por %p1050_p3, %p1049_p11 }
 0x1b2   : > { %p1052_p13 = pnand %p1051_p5, %p1045_p10 }
 0x1b4   : > { %1055 = shalt.err (!%p1052_p13)
}
 0x1b5   : > { %s1056_s9 = scalar_lea.hbm %s1471_s11, 64  ;;  %s1060_s3 = scalar_lea.hbm %s1584_s15, 256 }
 0x1b6   : > { %p1057_p4 = scmp.ne.s32.totalorder %s1471_s11, %s1056_s9  ;;  %p1061_p0 = scmp.lt.u32.totalorder %s1471_s11, %s1584_s15 }
 0x1b7   : > { %p1062_p7 = scmp.lt.u32.totalorder %s1060_s3, %s1056_s9  ;;  %p1064_p6 = scmp.lt.u32.totalorder %s1056_s9, %s1471_s11 }
 0x1b8   : > { %p1058_p12 = pnand %p1057_p4, %p1585_p9 }
 0x1b9   : > { %p1063_p1 = por %p1062_p7, %p1061_p0 }
 0x1ba   : > { %p1059_p2 = pneg %p1058_p12 }
 0x1bb   : > { %p1065_p8 = por %p1064_p6, %p1063_p1 }
 0x1bd   : > { %p1066_p10 = pnand %p1065_p8, %p1059_p2 }
 0x1bf   : > { %1069 = shalt.err (!%p1066_p10)
}
 0x1c0   : > { %759 = dma.vmem_to_hbm [thread:$0]  (%p1585_p9), %s1473_s6, 64, %s1471_s11, %s496_s30  }
 0x1c1 PF: > { %p795_p11 = scmp.ge.s32.totalorder %s1152_s28, 2  ;;  %s538_s24 = sand.u32 1, %s1124_s21  }
 0x1c2   : > { %p1586_p3 = scmp.ne.s32.totalorder %s1578_s13, 0  ;;  %s539_s1 = scalar_lea.sflag [#allocation4], %s538_s24 }
 0x1c4   : > { %p780_p5 = pnand %p795_p11, %p1586_p3 }
 0x1c6   : > { %1115 = dma.done.wait (!%p780_p5), %s539_s1, 64  }
 0x1c7   : > { %1117 = vsyncadd (!%p780_p5), %s539_s1, 4294967232  ;;  %s548_s2 = scalar_lea.sflag [#allocation13], %s538_s24 }
 0x1c8   : > { %1119 = dma.done.wait (!%p780_p5), %s548_s2, 64  }
 0x1c9   : > { %1121 = vsyncadd (!%p780_p5), %s548_s2, 4294967232  ;;  %s28_s28 = sadd.s32 1, %s1152_s28   ;;  %s1587_s21 = smov %s1128_s22 }
 0x1ca   : > { %p25_p13 = scmp.ge.s32.totalorder %s28_s28, 6   ;;  %s1588_s22 = smov %s1132_s23 }
 0x1cb   : > { %s1589_s23 = smov %s1397_s12  ;;  %s1590_s24 = smov %s1144_s26 }
 0x1cc   : > { %s1591_s25 = smov %s1148_s27  ;;  %s1592_s26 = smov %s1595_s20 }
 0x1cd   : > { %s1593_s27 = smov %s1599_s10  ;;  %27 = sbr.rel (!%p25_p13) target bundleno = 17 (0x11), region = 118 }
 0x1d4   :  { %553 = vsyncpa [#allocation3], 1 }
 0x1d5   :  { %555 = vsyncpa [#allocation3 + $0x1], 1 }
 0x1d6   :  { %556 = vsyncpa [#allocation6], 1 }
 0x1d7   :  { %557 = vsyncpa [#allocation9], 1 }
 0x1d8   :  { %558 = vsyncpa [#allocation4], 1 }
 0x1d9   :  { %560 = vsyncpa [#allocation4 + $0x1], 1 }
 0x1da   :  { %561 = vsyncpa [#allocation13], 1 }
 0x1db   :  { %563 = vsyncpa [#allocation13 + $0x1], 1 }

</bundles_post_ra>
